<compile_context>
chip_gen: v7x
topology: tpu7x:2x2x1
jax: 0.10.0
libtpu: 0.0.40
codegen_flags: <defaults>
</compile_context>

<pallas_src>
import functools

import jax
import jax.numpy as jnp
from jax.experimental import pallas as pl
from jax.experimental.pallas import tpu as pltpu


_NEG_INIT = -3.0e38  # finite f32 "neg-infinity": exp(_NEG_INIT - m) == 0, no NaNs


def _entropy_single_kernel(x_ref, row_ref):
    """Per-row softmax entropy, whole class dim in one tile.

    Grid: (row_tiles,).  x_ref: (TM, C) logits; row_ref: (TM, 1) entropies.
    """
    x = x_ref[...].astype(jnp.float32)                        # (TM, C)
    m = jnp.max(x, axis=1, keepdims=True)                     # (TM, 1)
    z = x - m
    ez = jnp.exp(z)
    s = jnp.sum(ez, axis=1, keepdims=True)                    # sum exp(z)
    t = jnp.sum(ez * z, axis=1, keepdims=True)                # sum exp(z) * z
    # EUP approximate reciprocal + one Newton step (tiny (TM, 1) column).
    inv_s = pl.reciprocal(s, approx=True)
    inv_s = inv_s * (2.0 - s * inv_s)
    # entropy = log(sum exp z) - sum(exp(z) * z) / sum(exp z)
    row_ref[...] = (jnp.log(s) - t * inv_s).astype(row_ref.dtype)


def _entropy_stream_kernel(x_ref, row_ref, m_acc, s_acc, t_acc,
                           *, classes, tc, mask_classes):
    """Streaming per-row softmax entropy (online log-sum-exp over class tiles).

    Grid: (row_tiles, class_tiles); class axis last ("arbitrary").
    x_ref  : (TM, TC)  logits tile
    row_ref: (TM, 1)   per-row entropy (written on the last class tile)
    m_acc  : (TM, 1)   running row max                     (VMEM scratch, f32)
    s_acc  : (TM, 1)   running sum exp(x - m)              (VMEM scratch, f32)
    t_acc  : (TM, 1)   running sum exp(x - m) * (x - m)    (VMEM scratch, f32)
    `classes`, `tc`, `mask_classes` are trace-time constants.
    """
    j = pl.program_id(1)

    @pl.when(j == 0)
    def _init():
        m_acc[...] = jnp.full_like(m_acc, _NEG_INIT)
        s_acc[...] = jnp.zeros_like(s_acc)
        t_acc[...] = jnp.zeros_like(t_acc)

    x = x_ref[...].astype(jnp.float32)                        # (TM, TC)
    if mask_classes:
        # Only emitted when C % TC != 0: mask out-of-range classes on the
        # (possibly stale) boundary block so they contribute exp(..) == 0.
        col = jax.lax.broadcasted_iota(jnp.int32, x.shape, 1) + j * tc
        x = jnp.where(col < classes, x, _NEG_INIT)

    m_prev = m_acc[...]
    m_new = jnp.maximum(m_prev, jnp.max(x, axis=1, keepdims=True))
    # Clamp so exp underflow can never pair with an infinite factor (NaN-safe).
    delta = jnp.maximum(m_prev - m_new, _NEG_INIT)            # <= 0
    alpha = jnp.exp(delta)

    z = jnp.maximum(x - m_new, _NEG_INIT)
    ez = jnp.exp(z)

    s_prev = s_acc[...]
    # Rescale old partial sums to the new max and accumulate this tile.
    s_acc[...] = alpha * s_prev + jnp.sum(ez, axis=1, keepdims=True)
    t_acc[...] = alpha * (t_acc[...] + delta * s_prev) + jnp.sum(
        ez * z, axis=1, keepdims=True
    )
    m_acc[...] = m_new

    @pl.when(j == pl.num_programs(1) - 1)
    def _finalize():
        s = s_acc[...]
        inv_s = pl.reciprocal(s, approx=True)
        inv_s = inv_s * (2.0 - s * inv_s)                     # one Newton step
        row_ref[...] = (jnp.log(s) - t_acc[...] * inv_s).astype(row_ref.dtype)


def _round_up(a, b):
    return (a + b - 1) // b * b


def _choose_tiles(n, c, itemsize, block_rows=None, block_classes=None):
    """Pick (row_tile, class_tile) against a generation-safe VMEM budget."""
    # ---- class (lane) tile --------------------------------------------------
    if block_classes is not None:
        tc = min(int(block_classes), c)
        if tc != c:
            assert tc % 128 == 0, "class tile must be a multiple of 128 or full C"
    elif c <= 8192:
        tc = c                       # one lane-dense block over all classes
    else:
        tc = 2048                    # stream large class dims (online LSE)

    # ---- row (sublane) tile -------------------------------------------------
    if block_rows is not None:
        tm = int(block_rows)
        assert tm % 8 == 0 or tm == n, "row tile must be a multiple of 8 or N"
    else:
        # Pallas double-buffers the input tile; ~8 MiB fits the scoped-VMEM
        # default on every generation (v5e 16 MiB, v6e/v7x 32 MiB) with room
        # for the output / scratch columns.
        budget = 8 * 1024 * 1024
        tm = budget // max(1, 2 * tc * itemsize)
        tm = max(8, min(4096, tm))
        tm -= tm % 8
        # Don't pad tiny batches up to a huge tile.
        tm = min(tm, _round_up(n, 8))
    return tm, tc


@functools.partial(jax.jit, static_argnames=("reduction", "block_rows", "block_classes"))
def entropy_loss(x, reduction=True, block_rows=None, block_classes=None):
    """Pallas implementation of EntropyLoss.forward for 2-D x of shape (N, C)."""
    n, c = x.shape
    tm, tc = _choose_tiles(n, c, x.dtype.itemsize, block_rows, block_classes)
    grid_r = pl.cdiv(n, tm)
    grid_c = pl.cdiv(c, tc)

    if grid_c == 1:
        # Single class tile (tc == full C): branch-free kernel, no scratch.
        rows = pl.pallas_call(
            _entropy_single_kernel,
            out_shape=jax.ShapeDtypeStruct((n, 1), jnp.float32),
            grid_spec=pltpu.PrefetchScalarGridSpec(
                num_scalar_prefetch=0,
                grid=(grid_r,),
                in_specs=[pl.BlockSpec((tm, tc), lambda i: (i, 0))],
                out_specs=pl.BlockSpec((tm, 1), lambda i: (i, 0)),
            ),
            compiler_params=pltpu.CompilerParams(
                dimension_semantics=("parallel",),
            ),
        )(x)
    else:
        kernel = functools.partial(
            _entropy_stream_kernel,
            classes=c, tc=tc, mask_classes=(c % tc != 0),
        )
        rows = pl.pallas_call(
            kernel,
            out_shape=jax.ShapeDtypeStruct((n, 1), jnp.float32),
            grid_spec=pltpu.PrefetchScalarGridSpec(
                num_scalar_prefetch=0,
                grid=(grid_r, grid_c),
                in_specs=[pl.BlockSpec((tm, tc), lambda i, j: (i, j))],
                out_specs=pl.BlockSpec((tm, 1), lambda i, j: (i, 0)),
                scratch_shapes=[
                    pltpu.VMEM((tm, 1), jnp.float32),   # running max
                    pltpu.VMEM((tm, 1), jnp.float32),   # running sum exp
                    pltpu.VMEM((tm, 1), jnp.float32),   # running sum exp*z
                ],
            ),
            compiler_params=pltpu.CompilerParams(
                # Rows are independent -> "parallel" (shards across v7x TCs);
                # the class axis carries the accumulators -> "arbitrary", last.
                dimension_semantics=("parallel", "arbitrary"),
            ),
        )(x)

    ent = rows[:, 0]
    if reduction:
        return jnp.sum(ent) / n      # -sum(b) / batch
    return ent                       # per-sample entropies


def _entropy_ref(x, reduction=True):
    """Pure-JAX reference matching the PyTorch module."""
    logp = jax.nn.log_softmax(x, axis=1)
    b = jnp.exp(logp) * logp
    if reduction:
        return -jnp.sum(b) / x.shape[0]
    return -jnp.sum(b, axis=1)


if __name__ == "__main__":
    key = jax.random.PRNGKey(0)
    k1, k2 = jax.random.split(key)

    # Small logits consistent with the module's (N, C), softmax over dim=1.
    x1 = jax.random.normal(k1, (16, 32), dtype=jnp.float32) * 3.0
    # Ragged shape: exercises row-tail / class-tail boundary blocks and (when
    # tiles are forced small) the multi-tile online log-sum-exp + class mask.
    x2 = jax.random.normal(k2, (20, 300), dtype=jnp.float32) * 2.0

    outs = {
        "mean1": entropy_loss(x1, reduction=True),
        "vec1": entropy_loss(x1, reduction=False),
        # Default tiles: single-class-tile kernel with a row-tail boundary.
        "mean2": entropy_loss(x2, reduction=True),
        "vec2": entropy_loss(x2, reduction=False),
        # Forced small tiles: streaming kernel, class mask, row/class tails.
        "mean3": entropy_loss(x2, reduction=True, block_rows=8, block_classes=128),
        "vec3": entropy_loss(x2, reduction=False, block_rows=8, block_classes=128),
    }
    outs = {k: jax.block_until_ready(v) for k, v in outs.items()}

    refs = {
        "mean1": _entropy_ref(x1, reduction=True),
        "vec1": _entropy_ref(x1, reduction=False),
        "mean2": _entropy_ref(x2, reduction=True),
        "vec2": _entropy_ref(x2, reduction=False),
        "mean3": _entropy_ref(x2, reduction=True),
        "vec3": _entropy_ref(x2, reduction=False),
    }

    for name in outs:
        assert jnp.allclose(outs[name], refs[name], rtol=1e-4, atol=1e-5), (
            name, outs[name], refs[name])

    print("KERNEL_OK")
</pallas_src>

<mosaic_0001>
module attributes {stable_mosaic.version = 11 : i64} {
  func.func @_entropy_single_kernel(%arg0: i32, %arg1: memref<16x32xf32, #tpu.memory_space<vmem>>, %arg2: memref<16x1xf32, #tpu.memory_space<vmem>>) attributes {dimension_semantics = [#tpu.dimension_semantics<parallel>], iteration_bounds = array<i64: 1>, scalar_prefetch = 0 : i64, scratch_operands = 0 : i64, tpu.core_type = #tpu.core_type<tc>, window_params = [{transform_indices = @transform_0, window_bounds = array<i64: 16, 32>}, {transform_indices = @transform_1, window_bounds = array<i64: 16, 1>}]} {
    %c0 = arith.constant 0 : index
    %c0_0 = arith.constant 0 : index
    %0 = vector.load %arg1[%c0, %c0_0] : memref<16x32xf32, #tpu.memory_space<vmem>>, vector<16x32xf32>
    %cst = arith.constant dense<0xFF800000> : vector<16xf32>
    %1 = vector.multi_reduction <maximumf>, %0, %cst [1] : vector<16x32xf32> to vector<16xf32>
    %2 = vector.shape_cast %1 : vector<16xf32> to vector<16x1xf32>
    %3 = vector.broadcast %2 : vector<16x1xf32> to vector<16x32xf32>
    %4 = arith.subf %0, %3 : vector<16x32xf32>
    %5 = math.exp %4 : vector<16x32xf32>
    %cst_1 = arith.constant dense<0.000000e+00> : vector<16xf32>
    %6 = vector.multi_reduction <add>, %5, %cst_1 [1] : vector<16x32xf32> to vector<16xf32>
    %7 = vector.shape_cast %6 : vector<16xf32> to vector<16x1xf32>
    %8 = arith.mulf %5, %4 : vector<16x32xf32>
    %cst_2 = arith.constant dense<0.000000e+00> : vector<16xf32>
    %9 = vector.multi_reduction <add>, %8, %cst_2 [1] : vector<16x32xf32> to vector<16xf32>
    %10 = vector.shape_cast %9 : vector<16xf32> to vector<16x1xf32>
    %11 = tpu.reciprocal %7 {approx = true} : vector<16x1xf32> -> vector<16x1xf32>
    %12 = arith.mulf %7, %11 : vector<16x1xf32>
    %cst_3 = arith.constant 2.000000e+00 : f32
    %13 = vector.broadcast %cst_3 : f32 to vector<16x1xf32>
    %14 = arith.subf %13, %12 : vector<16x1xf32>
    %15 = arith.mulf %11, %14 : vector<16x1xf32>
    %16 = math.log %7 : vector<16x1xf32>
    %17 = arith.mulf %10, %15 : vector<16x1xf32>
    %18 = arith.subf %16, %17 : vector<16x1xf32>
    %c0_4 = arith.constant 0 : index
    %c0_5 = arith.constant 0 : index
    %19 = vector.load %arg2[%c0_4, %c0_5] : memref<16x1xf32, #tpu.memory_space<vmem>>, vector<16x1xf32>
    tpu.vector_store %arg2[%c0_4, %c0_5], %18 {strides = array<i32>} : memref<16x1xf32, #tpu.memory_space<vmem>>, vector<16x1xf32>,
    return
  }
  func.func @transform_0(%arg0: i32) -> (i32, i32) {
    %c0_i32 = arith.constant 0 : i32
    %c0_i32_0 = arith.constant 0 : i32
    return %arg0, %c0_i32 : i32, i32
  }
  func.func @transform_1(%arg0: i32) -> (i32, i32) {
    %c0_i32 = arith.constant 0 : i32
    %c0_i32_0 = arith.constant 0 : i32
    return %arg0, %c0_i32 : i32, i32
  }
}

</mosaic_0001>

<bundles_post_ra>
// kernel: entropy_loss.1
= control target key start
LH: loop header
LB: loop body
LE: loop exit
PB: predicated region body
PF: predicated region fallthrough
CT: control target
= control target key end

     0   :  { %6 = vsyncpa [#allocation3], 0  ;;  %s114_s6 = smov [#allocation2]   ;;  %s151_s0 = inlined_call_operand.hbm [shape: f32[16,32], index: 0, kind: input, shape index: {}]   ;;  %s152_s1 = inlined_call_operand.vmem [shape: f32[16,1], index: 1, kind: output, shape index: {}]  }
   0x1   :  { %s12_s7 = sshll.u32 %s114_s6, 4  ;;  %s90_s10 = scalar_lea.hbm %s151_s0, 256  ;;  %s13_s7 = int_to_ptr.vmem [resolvable:$true] %s12_s7 }
   0x2   :  { %p91_p0 = scmp.ne.s32.totalorder %s151_s0, %s90_s10  ;;  %p94_p1 = scmp.lt.u32.totalorder %s90_s10, %s151_s0 }
   0x4   :  { %p96_p2 = pnand %p94_p1, %p91_p0 }
   0x6   :  { %99 = shalt.err (!%p96_p2)
}
   0x7   :  { %s100_s15 = scalar_lea.vmem %s13_s7, 256  ;;  %p105_p4 = scmp.lt.s32.totalorder %s13_s7, %s13_s7 }
   0x8   :  { %p101_p3 = scmp.ne.s32.totalorder %s13_s7, %s100_s15  ;;  %p106_p5 = scmp.lt.s32.totalorder %s100_s15, %s100_s15 }
   0xa   :  { %p107_p6 = por %p106_p5, %p105_p4 }
   0xc   :  { %p108_p7 = pnand %p107_p6, %p101_p3 }
   0xe   :  { %111 = shalt.err (!%p108_p7)
}
   0xf   :  { %s115_s16 = smov 128   ;;  %s116_s17 = smov 8  }
  0x10   :  { %18 = dma.hbm_to_vmem [thread:$0]  %s151_s0, 256, %s13_s7, [#allocation3], %s115_s16, %s115_s16, %s116_s17  }
  0x11   :  { %112 = dma.done.wait [#allocation3], 256  }
  0x12   :  { %113 = vsyncadd [#allocation3], 4294967040  ;;  %vm24_vm0 = vcmask 261120   ;;  %v22_v0 = vld [vmem:[#allocation2] sm:$0xff]  ;;  %v23_v1 = vld [vmem:[#allocation2 + $0x8] sm:$0xff]  ;;  %vm67_vm1 = vcmask 7168  }
  0x13   :  { %v25_v2 = vsel %vm24_vm0, %v22_v0, -inf  ;;  %v28_v3 = vsel %vm24_vm0, %v23_v1, -inf }
  0x14   :  { %26 = vmax.xlane.f32.xlu0 %v25_v2 }
  0x18   :  { %29 = vmax.xlane.f32.xlu0 %v28_v3 }
  0xa1   :  { %v27_v4 = vpop.xlane.xlu0 %26 }
  0xa2   :  { %v31_v5 = vsub.f32 %v22_v0, %v27_v4 }
  0xa4   :  { %v33_v6 = vmul.f32 1.442695, %v31_v5 }
  0xa5   :  { %v30_v7 = vpop.xlane.xlu0 %29 }
  0xa6   :  { %78 = vpow2.f32 %v33_v6  ;;  %v32_v8 = vsub.f32 %v23_v1, %v30_v7 }
  0xa8   :  { %v35_v9 = vmul.f32 1.442695, %v32_v8 }
  0xaa   :  { %80 = vpow2.f32 %v35_v9 }
  0xb0   :  { %v79_v10 = vpop.eup %78 }
  0xb1   :  { %v37_v11 = vsel %vm24_vm0, %v79_v10, 0.0  ;;  %v43_v12 = vmul.f32 %v79_v10, %v31_v5 }
  0xb2   :  { %38 = vadd.xlane.f32.xlu1 %v37_v11 }
  0xb3   :  { %v45_v13 = vsel %vm24_vm0, %v43_v12, 0.0 }
  0xb4   :  { %v81_v14 = vpop.eup %80  ;;  %46 = vadd.xlane.f32.xlu0 %v45_v13 }
  0xb5   :  { %v40_v15 = vsel %vm24_vm0, %v81_v14, 0.0  ;;  %v44_v16 = vmul.f32 %v81_v14, %v32_v8 }
  0xb6   :  { %41 = vadd.xlane.f32.xlu1 %v40_v15 }
  0xb7   :  { %v48_v17 = vsel %vm24_vm0, %v44_v16, 0.0 }
  0xba   :  { %49 = vadd.xlane.f32.xlu1 %v48_v17 }
 0x13f   :  { %v39_v18 = vpop.xlane.xlu1 %38 }
 0x140   :  { %82 = vrcp.f32 %v39_v18 }
 0x141   :  { %84 = vlog2.f32 %v39_v18  ;;  %v47_v27 = vpop.xlane.xlu0 %46 }
 0x143   :  { %v42_v19 = vpop.xlane.xlu1 %41 }
 0x144   :  { %86 = vrcp.f32 %v42_v19 }
 0x145   :  { %88 = vlog2.f32 %v42_v19 }
 0x147   :  { %v50_v34 = vpop.xlane.xlu1 %49 }
 0x14a   :  { %v83_v20 = vpop.eup %82 }
 0x14b   :  { %v53_v21 = vmul.f32 %v83_v20, %v39_v18  ;;  %v85_v22 = vpop.eup %84 }
 0x14c   :  { %v60_v28 = vmul.f32 0.6931472, %v85_v22 }
 0x14d   :  { %v55_v23 = vsub.f32 2.0, %v53_v21 }
 0x14e   :  { %v87_v24 = vpop.eup %86 }
 0x14f   :  { %v57_v25 = vmul.f32 %v83_v20, %v55_v23  ;;  %v54_v26 = vmul.f32 %v87_v24, %v42_v19  ;;  %v89_v31 = vpop.eup %88 }
 0x150   :  { %v62_v35 = vmul.f32 0.6931472, %v89_v31 }
 0x151   :  { %v63_v29 = vmul.f32 %v57_v25, %v47_v27  ;;  %v56_v30 = vsub.f32 2.0, %v54_v26 }
 0x153   :  { %v65_v32 = vsub.f32 %v60_v28, %v63_v29  ;;  %v58_v33 = vmul.f32 %v87_v24, %v56_v30 }
 0x155   :  { %68 = vst.msk [vmem:[%s152_s1] sm:$0xff] %vm67_vm1, %v65_v32  ;;  %v64_v36 = vmul.f32 %v58_v33, %v50_v34 }
 0x157   :  { %v66_v37 = vsub.f32 %v62_v35, %v64_v36 }
 0x159   :  { %69 = vst.msk [vmem:[%s152_s1 + $0x8] sm:$0xff] %vm67_vm1, %v66_v37 }
 0x15a   :  { %74 = vsyncpa [#allocation3], 1 }

</bundles_post_ra>
